<compile_context>
chip_gen: v5e
topology: v5e:2x2
jax: 0.10.0
libtpu: 0.0.40
codegen_flags: <defaults>
</compile_context>

<pallas_src>
import numpy as np
from collections import deque

import jax
import jax.numpy as jnp
from jax.experimental import pallas as pl
from jax.experimental.pallas import tpu as pltpu

# ----------------------- model hyper-parameters -----------------------
INPUT_DIM = 6
HIDDEN_DIM = 32
MAX_STEP = 3                       # walk_length = MAX_STEP + 1
HIDDEN_GRAPHS = 4                  # num_walks per graph
SIZE_HIDDEN_GRAPHS = 5
PENULTIMATE_DIM = 16
NUM_CLASSES = 3
ALPHA = 1.0
C = 0.15
BN_EPS = 1e-5
GATE_PAD = 128                     # per-gate lane padding (vreg-aligned gates)


# ======================================================================
# Host-side random-walk sampling (ExplicitRandomWalkEncoder.sample_random_walks)
# TODO(synk): BFS shortest paths + multinomial walk sampling are inherently
# host-side, data-dependent control flow with no clean Pallas equivalent;
# reproduced here in numpy with a fixed RNG.
# ======================================================================
def _bfs_distances(adj, n, max_distance=4):
    dist = np.full((n, n), max_distance + 1, dtype=np.float32)
    np.fill_diagonal(dist, 0.0)
    adj_list = [np.nonzero(adj[i])[0] for i in range(n)]
    for start in range(n):
        visited = np.zeros(n, dtype=bool)
        visited[start] = True
        q = deque([(start, 0)])
        while q:
            node, d = q.popleft()
            if d >= max_distance:
                continue
            for nb in adj_list[node]:
                if not visited[nb]:
                    visited[nb] = True
                    dist[start, nb] = d + 1
                    q.append((nb, d + 1))
    return dist


def _walk_probs(dist, alpha, c):
    w = np.exp(-alpha * dist)                       # walk_type == 'exp'
    rs = w.sum(axis=1, keepdims=True)
    rs[rs == 0] = 1.0
    g = w / rs
    n = dist.shape[0]
    return (1.0 - c) * g + c * np.ones((n, n)) / n


def sample_random_walks(edge_index, batch, num_walks, walk_length, alpha, c, rng):
    walks, walk_batch = [], []
    batch_size = int(batch.max()) + 1
    for gidx in range(batch_size):
        nodes = np.nonzero(batch == gidx)[0]
        n = nodes.size
        if n <= 1:
            continue
        g2l = {int(v): i for i, v in enumerate(nodes)}
        mask = np.isin(edge_index[0], nodes) & np.isin(edge_index[1], nodes)
        ge = edge_index[:, mask]
        if ge.size == 0:
            continue
        adj = np.zeros((n, n), np.float32)
        for e in range(ge.shape[1]):
            adj[g2l[int(ge[0, e])], g2l[int(ge[1, e])]] = 1.0
        probs = _walk_probs(_bfs_distances(adj, n), alpha, c)
        if num_walks >= n:
            starts = np.arange(n)
        else:
            starts = rng.permutation(n)[:num_walks]
        for s in starts:
            cur = int(s)
            walk = [int(nodes[cur])]
            for _ in range(walk_length - 1):
                p = probs[cur] / probs[cur].sum()
                cur = int(rng.choice(n, p=p))
                walk.append(int(nodes[cur]))
            walks.append(walk)
            walk_batch.append(gidx)
    return np.asarray(walks, np.int32), np.asarray(walk_batch, np.int32)


# ======================================================================
# Parameter preparation (one-time, NOT per forward call)
# ======================================================================
def _bn_fold(gamma, beta, mean, var):
    scale = (gamma / jnp.sqrt(var + BN_EPS)).astype(jnp.float32)
    shift = (beta - mean * scale).astype(jnp.float32)
    return scale, shift                       # flat (C,) vectors


def _pad_gates(w):
    """(rows, 3H) with columns [r|z|n] -> (rows, 3*GATE_PAD), each gate block
    starting on a 128-lane boundary (zero-filled padding columns)."""
    rows = w.shape[0]
    out = jnp.zeros((rows, 3 * GATE_PAD), w.dtype)
    for g in range(3):
        out = out.at[:, g * GATE_PAD:g * GATE_PAD + HIDDEN_DIM].set(
            w[:, g * HIDDEN_DIM:(g + 1) * HIDDEN_DIM])
    return out


def prepare_params(params):
    """One-time weight massaging:
      * feature encoder folded into GRU input-side weights (exact),
      * GRU gate blocks padded to 128-lane boundaries,
      * both eval-mode BatchNorm affines folded into fc1 (exact),
      * MXU weights of the big matmuls stored as bf16."""
    fe_wt = params["fe_w"].T.astype(jnp.float32)           # (F, H)
    fe_b = params["fe_b"].astype(jnp.float32)               # (H,)
    wih_t = params["gru_wih"].T.astype(jnp.float32)         # (H, 3H) cols [r|z|n]
    whh_t = params["gru_whh"].T.astype(jnp.float32)         # (H, 3H)
    bih = params["gru_bih"].astype(jnp.float32)              # (3H,)
    bhh = params["gru_bhh"].astype(jnp.float32)              # (3H,)

    # fold feature encoder into the input-side GRU gates (x_enc only feeds Wih)
    w_in = fe_wt @ wih_t                                      # (F, 3H)
    b_in = fe_b @ wih_t + bih                                 # (3H,)

    w_in_pad = _pad_gates(w_in)                               # (F, 3*128)
    b_in_pad = _pad_gates(b_in.reshape(1, -1))                # (1, 3*128)
    whh_pad = _pad_gates(whh_t)                               # (H, 3*128)
    bhh_pad = _pad_gates(bhh.reshape(1, -1))                  # (1, 3*128)

    # fold bn (pre-fc1) and bn1 (post-fc1) into fc1 (eval-mode running stats)
    bn_s, bn_b = _bn_fold(params["bn_gamma"], params["bn_beta"],
                          params["bn_mean"], params["bn_var"])     # (H,)
    bn1_s, bn1_b = _bn_fold(params["bn1_gamma"], params["bn1_beta"],
                            params["bn1_mean"], params["bn1_var"])  # (P,)
    fc1_wt = params["fc1_w"].T.astype(jnp.float32)            # (H, P)
    fc1_b = params["fc1_b"].astype(jnp.float32)                # (P,)
    fc1_wt_fold = (bn_s[:, None] * fc1_wt) * bn1_s[None, :]
    fc1_b_fold = (bn_b @ fc1_wt + fc1_b) * bn1_s + bn1_b

    return {
        "w_in": w_in_pad.astype(jnp.bfloat16),                 # (F, 384) bf16
        "b_in": b_in_pad,                                       # (1, 384) f32
        "whh": whh_pad.astype(jnp.bfloat16),                    # (H, 384) bf16
        "bhh": bhh_pad,                                          # (1, 384) f32
        "fc1_wt": fc1_wt_fold,                                   # (H, P) f32
        "fc1_b": fc1_b_fold.reshape(1, -1),                      # (1, P) f32
        "fc2_wt": params["fc2_w"].T.astype(jnp.float32),         # (P, C) f32
        "fc2_b": params["fc2_b"].reshape(1, -1).astype(jnp.float32),
    }


# ======================================================================
# Fused Pallas kernel: whole graph-classification forward in one launch
# ======================================================================
_VMEM_SPEC = pl.BlockSpec(memory_space=pltpu.MemorySpace.VMEM)


def _fused_forward_kernel(
    walks_ref, wbatch_ref, x_ref,
    w_in_ref, b_in_ref, whh_ref, bhh_ref,
    fc1_wt_ref, fc1_b_ref, fc2_wt_ref, fc2_b_ref,
    o_ref,
):
    n_nodes = x_ref.shape[0]
    tnw = walks_ref.shape[0]                 # T * NW (t-major rows)
    n_walks = wbatch_ref.shape[1]            # NW
    t_len = tnw // n_walks
    h_dim = HIDDEN_DIM
    gp = GATE_PAD
    num_graphs = o_ref.shape[0]

    # ---- 1) per-node GRU input-side gates (feature encoder pre-folded) ----
    x_bf = x_ref[...].astype(jnp.bfloat16)
    gi_nodes = (jnp.dot(x_bf, w_in_ref[...], preferred_element_type=jnp.float32)
                + b_in_ref[...])                                   # (N, 3*GP) f32
    gi_nodes_bf = gi_nodes.astype(jnp.bfloat16)

    # ---- 2) hoisted walk gather: one (T*NW, N) one-hot matmul, outside loop ----
    # TODO(synk): for large N replace the O(NW*N) one-hot with a scalar-prefetch
    # (PrefetchScalarGridSpec) index gather; the one-hot path is best for small N.
    walks_col = walks_ref[...]                                     # (T*NW, 1) int32
    node_iota = jax.lax.broadcasted_iota(jnp.int32, (tnw, n_nodes), 1)
    sel = (walks_col == node_iota).astype(jnp.bfloat16)            # exact in bf16
    gi_all = jnp.dot(sel, gi_nodes_bf,
                     preferred_element_type=jnp.float32)           # (T*NW, 3*GP)

    # ---- 3) GRU recurrence, fully unrolled; only h@Whh on the serial chain ----
    whh = whh_ref[...]                                             # (H, 3*GP) bf16
    bhh = bhh_ref[...]                                             # (1, 3*GP) f32
    h = jnp.zeros((n_walks, h_dim), jnp.float32)
    for t in range(t_len):
        gi = gi_all[t * n_walks:(t + 1) * n_walks]                 # (NW, 3*GP)
        gh = jnp.dot(h.astype(jnp.bfloat16), whh,
                     preferred_element_type=jnp.float32) + bhh     # (NW, 3*GP)
        # gates start at lane offsets 0 / 128 / 256 -> all slices are offset-0
        # views inside their own 128-lane vreg (no per-step lane rotates).
        r = jax.nn.sigmoid(gi[:, 0:h_dim] + gh[:, 0:h_dim])
        z = jax.nn.sigmoid(gi[:, gp:gp + h_dim] + gh[:, gp:gp + h_dim])
        n = jnp.tanh(gi[:, 2 * gp:2 * gp + h_dim]
                     + r * gh[:, 2 * gp:2 * gp + h_dim])
        h = (1.0 - z) * n + z * h                                  # (NW, H) f32

    # ---- 4) per-graph mean pooling (segment mean via one-hot matmul) ----
    # NOTE: graphs that produced zero walks get count clamped to 1 -> pooled=0
    # (PyTorch reference keeps a zero row too since mask.sum()==0 skips it).
    wb = wbatch_ref[...]                                           # (1, NW) int32
    g_iota = jax.lax.broadcasted_iota(jnp.int32, (num_graphs, n_walks), 0)
    onehot = (wb == g_iota).astype(jnp.float32)                    # (B, NW)
    counts = jnp.maximum(jnp.sum(onehot, axis=1, keepdims=True), 1.0)
    pooled = jnp.dot(onehot / counts, h,
                     preferred_element_type=jnp.float32)           # (B, H)

    # ---- 5) fc1 (bn & bn1 pre-folded) -> relu -> fc2 -> log_softmax ----
    h1 = jnp.dot(pooled, fc1_wt_ref[...],
                 preferred_element_type=jnp.float32) + fc1_b_ref[...]
    h1 = jnp.maximum(h1, 0.0)                                      # dropout = id (eval)
    logits = jnp.dot(h1, fc2_wt_ref[...],
                     preferred_element_type=jnp.float32) + fc2_b_ref[...]
    m = jnp.max(logits, axis=-1, keepdims=True)
    lse = jnp.log(jnp.sum(jnp.exp(logits - m), axis=-1, keepdims=True)) + m
    o_ref[...] = logits - lse


def rw_gnn_forward_pallas(x, walks, walk_batch, num_graphs, prep):
    """x: (N, F_in) f32, walks: (NW, T) int32, walk_batch: (NW,) int32.
    prep: output of prepare_params(). Returns (num_graphs, NUM_CLASSES) log-probs."""
    # TODO(synk): for non-toy NW (esp. v7x, 2 TCs / 64 MiB VMEM) add a parallel
    # grid axis over walk tiles with per-tile pooled partial sums; a single
    # VMEM-resident launch is optimal at these sizes.
    nw, t_len = walks.shape
    assert nw >= 1, "sampler returned no walks"
    # t-major flattening so each GRU step reads a contiguous row block of gi_all
    walks_col = jnp.transpose(walks.astype(jnp.int32)).reshape(t_len * nw, 1)
    wbatch = walk_batch.reshape(1, -1).astype(jnp.int32)
    return pl.pallas_call(
        _fused_forward_kernel,
        out_shape=jax.ShapeDtypeStruct((num_graphs, NUM_CLASSES), jnp.float32),
        in_specs=[_VMEM_SPEC] * 11,
        out_specs=_VMEM_SPEC,
    )(
        walks_col,                    # (T*NW, 1) int32
        wbatch,                       # (1, NW)   int32
        x.astype(jnp.float32),        # (N, F_in) f32
        prep["w_in"], prep["b_in"],
        prep["whh"], prep["bhh"],
        prep["fc1_wt"], prep["fc1_b"],
        prep["fc2_wt"], prep["fc2_b"],
    )


# ======================================================================
# Pure-JAX reference (for correctness check)
# ======================================================================
def rw_gnn_forward_ref(x, walks, walk_batch, num_graphs, params):
    h_dim = HIDDEN_DIM
    xe = x @ params["fe_w"].T + params["fe_b"]
    wf = xe[walks]                                            # (NW, T, H)
    h = jnp.zeros((wf.shape[0], h_dim), jnp.float32)
    for t in range(wf.shape[1]):
        xt = wf[:, t, :]
        gi = xt @ params["gru_wih"].T + params["gru_bih"]
        gh = h @ params["gru_whh"].T + params["gru_bhh"]
        r = jax.nn.sigmoid(gi[:, :h_dim] + gh[:, :h_dim])
        z = jax.nn.sigmoid(gi[:, h_dim:2 * h_dim] + gh[:, h_dim:2 * h_dim])
        n = jnp.tanh(gi[:, 2 * h_dim:] + r * gh[:, 2 * h_dim:])
        h = (1.0 - z) * n + z * h
    ge = jnp.stack([h[np.asarray(walk_batch) == g].mean(0) for g in range(num_graphs)])
    bn_s, bn_b = _bn_fold(params["bn_gamma"], params["bn_beta"],
                          params["bn_mean"], params["bn_var"])
    bn1_s, bn1_b = _bn_fold(params["bn1_gamma"], params["bn1_beta"],
                            params["bn1_mean"], params["bn1_var"])
    ge = ge * bn_s + bn_b
    o = ge @ params["fc1_w"].T + params["fc1_b"]
    o = o * bn1_s + bn1_b
    o = jnp.maximum(o, 0.0)
    o = o @ params["fc2_w"].T + params["fc2_b"]
    return jax.nn.log_softmax(o, axis=-1)


# ======================================================================
if __name__ == "__main__":
    # ------------- deterministic parameters -------------
    key = jax.random.PRNGKey(0)
    ks = jax.random.split(key, 16)

    def u(k, shape, lo, hi):
        return jax.random.uniform(k, shape, jnp.float32, lo, hi)

    b_fe = 1.0 / np.sqrt(INPUT_DIM)
    b_h = 1.0 / np.sqrt(HIDDEN_DIM)
    b_p = 1.0 / np.sqrt(PENULTIMATE_DIM)
    params = {
        "fe_w": u(ks[0], (HIDDEN_DIM, INPUT_DIM), -b_fe, b_fe),
        "fe_b": u(ks[1], (HIDDEN_DIM,), -b_fe, b_fe),
        "gru_wih": u(ks[2], (3 * HIDDEN_DIM, HIDDEN_DIM), -b_h, b_h),
        "gru_whh": u(ks[3], (3 * HIDDEN_DIM, HIDDEN_DIM), -b_h, b_h),
        "gru_bih": u(ks[4], (3 * HIDDEN_DIM,), -b_h, b_h),
        "gru_bhh": u(ks[5], (3 * HIDDEN_DIM,), -b_h, b_h),
        "fc1_w": u(ks[6], (PENULTIMATE_DIM, HIDDEN_DIM), -b_h, b_h),
        "fc1_b": u(ks[7], (PENULTIMATE_DIM,), -b_h, b_h),
        "fc2_w": u(ks[8], (NUM_CLASSES, PENULTIMATE_DIM), -b_p, b_p),
        "fc2_b": u(ks[9], (NUM_CLASSES,), -b_p, b_p),
        # adj_hidden / features_hidden are declared by RW_GNN.__init__ but are
        # NOT used by the forward pass being reproduced; init for completeness.
        "adj_hidden": u(ks[10], (HIDDEN_GRAPHS, SIZE_HIDDEN_GRAPHS * (SIZE_HIDDEN_GRAPHS - 1) // 2), -1.0, 1.0),
        "features_hidden": u(ks[11], (HIDDEN_GRAPHS, SIZE_HIDDEN_GRAPHS, HIDDEN_DIM), 0.0, 1.0),
        # eval-mode BatchNorm1d running stats + affine (fresh model defaults)
        "bn_gamma": jnp.ones((HIDDEN_DIM,), jnp.float32),
        "bn_beta": jnp.zeros((HIDDEN_DIM,), jnp.float32),
        "bn_mean": jnp.zeros((HIDDEN_DIM,), jnp.float32),
        "bn_var": jnp.ones((HIDDEN_DIM,), jnp.float32),
        "bn1_gamma": jnp.ones((PENULTIMATE_DIM,), jnp.float32),
        "bn1_beta": jnp.zeros((PENULTIMATE_DIM,), jnp.float32),
        "bn1_mean": jnp.zeros((PENULTIMATE_DIM,), jnp.float32),
        "bn1_var": jnp.ones((PENULTIMATE_DIM,), jnp.float32),
    }

    # one-time kernel-friendly parameter layouts (folds, transposes, gate padding)
    prep = prepare_params(params)

    # ------------- deterministic example graph batch -------------
    nodes_per_graph, num_graphs = 8, 2
    num_nodes = nodes_per_graph * num_graphs
    x = jax.random.normal(ks[12], (num_nodes, INPUT_DIM), jnp.float32)
    batch_np = np.repeat(np.arange(num_graphs), nodes_per_graph).astype(np.int32)
    edges = []
    for g in range(num_graphs):
        base = g * nodes_per_graph
        for i in range(nodes_per_graph):          # bidirectional ring
            a, b = base + i, base + (i + 1) % nodes_per_graph
            edges.append((a, b))
            edges.append((b, a))
    edge_index_np = np.asarray(edges, np.int64).T          # (2, E)

    rng = np.random.default_rng(0)
    walks_np, walk_batch_np = sample_random_walks(
        edge_index_np, batch_np, HIDDEN_GRAPHS, MAX_STEP + 1, ALPHA, C, rng
    )
    walks = jnp.asarray(walks_np, jnp.int32)                # (NW, T)
    walk_batch = jnp.asarray(walk_batch_np, jnp.int32)      # (NW,)

    # ------------- run fused Pallas forward -------------
    out = rw_gnn_forward_pallas(x, walks, walk_batch, num_graphs, prep)
    out = jax.block_until_ready(out)

    # ------------- verify against pure-JAX reference -------------
    ref = rw_gnn_forward_ref(x, walks_np, walk_batch_np, num_graphs, params)
    ref = jax.block_until_ready(ref)
    assert out.shape == (num_graphs, NUM_CLASSES)
    assert np.all(np.isfinite(np.asarray(out)))
    np.testing.assert_allclose(np.asarray(out), np.asarray(ref), atol=5e-2, rtol=5e-2)

    print("KERNEL_OK")
</pallas_src>

<mosaic_0001>
module attributes {stable_mosaic.version = 11 : i64} {
  func.func @_fused_forward_kernel(%arg0: memref<32x1xi32, #tpu.memory_space<vmem>>, %arg1: memref<1x8xi32, #tpu.memory_space<vmem>>, %arg2: memref<16x6xf32, #tpu.memory_space<vmem>>, %arg3: memref<6x384xbf16, #tpu.memory_space<vmem>>, %arg4: memref<1x384xf32, #tpu.memory_space<vmem>>, %arg5: memref<32x384xbf16, #tpu.memory_space<vmem>>, %arg6: memref<1x384xf32, #tpu.memory_space<vmem>>, %arg7: memref<32x16xf32, #tpu.memory_space<vmem>>, %arg8: memref<1x16xf32, #tpu.memory_space<vmem>>, %arg9: memref<16x3xf32, #tpu.memory_space<vmem>>, %arg10: memref<1x3xf32, #tpu.memory_space<vmem>>, %arg11: memref<2x3xf32, #tpu.memory_space<vmem>>) attributes {dimension_semantics = [], scalar_prefetch = 0 : i64, scratch_operands = 0 : i64, tpu.core_type = #tpu.core_type<tc>} {
    %c0 = arith.constant 0 : index
    %c0_0 = arith.constant 0 : index
    %0 = vector.load %arg2[%c0, %c0_0] : memref<16x6xf32, #tpu.memory_space<vmem>>, vector<16x6xf32>
    %1 = arith.truncf %0 : vector<16x6xf32> to vector<16x6xbf16>
    %c0_1 = arith.constant 0 : index
    %c0_2 = arith.constant 0 : index
    %2 = vector.load %arg3[%c0_1, %c0_2] : memref<6x384xbf16, #tpu.memory_space<vmem>>, vector<6x384xbf16>
    %cst = arith.constant dense<0.000000e+00> : vector<16x384xf32>
    %3 = tpu.matmul %1, %2, %cst {dimension_numbers = #tpu.dot_dimension_numbers<[1], [0], [0], [1], [0, 0, 1, 1], [], []>} : vector<16x6xbf16>, vector<6x384xbf16>, vector<16x384xf32> -> vector<16x384xf32>
    %c0_3 = arith.constant 0 : index
    %c0_4 = arith.constant 0 : index
    %4 = vector.load %arg4[%c0_3, %c0_4] : memref<1x384xf32, #tpu.memory_space<vmem>>, vector<1x384xf32>
    %5 = vector.broadcast %4 : vector<1x384xf32> to vector<16x384xf32>
    %6 = arith.addf %3, %5 : vector<16x384xf32>
    %7 = arith.truncf %6 : vector<16x384xf32> to vector<16x384xbf16>
    %c0_5 = arith.constant 0 : index
    %c0_6 = arith.constant 0 : index
    %8 = vector.load %arg0[%c0_5, %c0_6] : memref<32x1xi32, #tpu.memory_space<vmem>>, vector<32x1xi32>
    %9 = tpu.iota {dimensions = array<i32: 1>} : vector<32x16xi32>
    %10 = vector.broadcast %8 : vector<32x1xi32> to vector<32x16xi32>
    %11 = arith.cmpi eq, %10, %9 : vector<32x16xi32>
    %12 = arith.extui %11 : vector<32x16xi1> to vector<32x16xi32>
    %13 = arith.sitofp %12 : vector<32x16xi32> to vector<32x16xf32>
    %14 = arith.truncf %13 : vector<32x16xf32> to vector<32x16xbf16>
    %cst_7 = arith.constant dense<0.000000e+00> : vector<32x384xf32>
    %15 = tpu.matmul %14, %7, %cst_7 {dimension_numbers = #tpu.dot_dimension_numbers<[1], [0], [0], [1], [0, 0, 1, 1], [], []>} : vector<32x16xbf16>, vector<16x384xbf16>, vector<32x384xf32> -> vector<32x384xf32>
    %c0_8 = arith.constant 0 : index
    %c0_9 = arith.constant 0 : index
    %16 = vector.load %arg5[%c0_8, %c0_9] : memref<32x384xbf16, #tpu.memory_space<vmem>>, vector<32x384xbf16>
    %c0_10 = arith.constant 0 : index
    %c0_11 = arith.constant 0 : index
    %17 = vector.load %arg6[%c0_10, %c0_11] : memref<1x384xf32, #tpu.memory_space<vmem>>, vector<1x384xf32>
    %cst_12 = arith.constant 0.000000e+00 : f32
    %18 = vector.broadcast %cst_12 : f32 to vector<8x32xf32>
    %19 = vector.extract_strided_slice %15 {offsets = [0, 0], sizes = [8, 384], strides = [1, 1]} : vector<32x384xf32> to vector<8x384xf32>
    %20 = arith.truncf %18 : vector<8x32xf32> to vector<8x32xbf16>
    %cst_13 = arith.constant dense<0.000000e+00> : vector<8x384xf32>
    %21 = tpu.matmul %20, %16, %cst_13 {dimension_numbers = #tpu.dot_dimension_numbers<[1], [0], [0], [1], [0, 0, 1, 1], [], []>} : vector<8x32xbf16>, vector<32x384xbf16>, vector<8x384xf32> -> vector<8x384xf32>
    %22 = vector.broadcast %17 : vector<1x384xf32> to vector<8x384xf32>
    %23 = arith.addf %21, %22 : vector<8x384xf32>
    %24 = vector.extract_strided_slice %19 {offsets = [0, 0], sizes = [8, 32], strides = [1, 1]} : vector<8x384xf32> to vector<8x32xf32>
    %25 = vector.extract_strided_slice %23 {offsets = [0, 0], sizes = [8, 32], strides = [1, 1]} : vector<8x384xf32> to vector<8x32xf32>
    %26 = arith.addf %24, %25 : vector<8x32xf32>
    %27 = arith.negf %26 : vector<8x32xf32>
    %28 = math.exp %27 : vector<8x32xf32>
    %cst_14 = arith.constant 1.000000e+00 : f32
    %29 = vector.broadcast %cst_14 : f32 to vector<8x32xf32>
    %30 = arith.addf %29, %28 : vector<8x32xf32>
    %31 = arith.divf %29, %30 : vector<8x32xf32>
    %32 = vector.extract_strided_slice %19 {offsets = [0, 128], sizes = [8, 32], strides = [1, 1]} : vector<8x384xf32> to vector<8x32xf32>
    %33 = vector.extract_strided_slice %23 {offsets = [0, 128], sizes = [8, 32], strides = [1, 1]} : vector<8x384xf32> to vector<8x32xf32>
    %34 = arith.addf %32, %33 : vector<8x32xf32>
    %35 = arith.negf %34 : vector<8x32xf32>
    %36 = math.exp %35 : vector<8x32xf32>
    %cst_15 = arith.constant 1.000000e+00 : f32
    %37 = vector.broadcast %cst_15 : f32 to vector<8x32xf32>
    %38 = arith.addf %37, %36 : vector<8x32xf32>
    %39 = arith.divf %37, %38 : vector<8x32xf32>
    %40 = vector.extract_strided_slice %19 {offsets = [0, 256], sizes = [8, 32], strides = [1, 1]} : vector<8x384xf32> to vector<8x32xf32>
    %41 = vector.extract_strided_slice %23 {offsets = [0, 256], sizes = [8, 32], strides = [1, 1]} : vector<8x384xf32> to vector<8x32xf32>
    %42 = arith.mulf %31, %41 : vector<8x32xf32>
    %43 = arith.addf %40, %42 : vector<8x32xf32>
    %44 = math.tanh %43 : vector<8x32xf32>
    %cst_16 = arith.constant 1.000000e+00 : f32
    %45 = vector.broadcast %cst_16 : f32 to vector<8x32xf32>
    %46 = arith.subf %45, %39 : vector<8x32xf32>
    %47 = arith.mulf %46, %44 : vector<8x32xf32>
    %48 = arith.mulf %39, %18 : vector<8x32xf32>
    %49 = arith.addf %47, %48 : vector<8x32xf32>
    %50 = vector.extract_strided_slice %15 {offsets = [8, 0], sizes = [8, 384], strides = [1, 1]} : vector<32x384xf32> to vector<8x384xf32>
    %51 = arith.truncf %49 : vector<8x32xf32> to vector<8x32xbf16>
    %cst_17 = arith.constant dense<0.000000e+00> : vector<8x384xf32>
    %52 = tpu.matmul %51, %16, %cst_17 {dimension_numbers = #tpu.dot_dimension_numbers<[1], [0], [0], [1], [0, 0, 1, 1], [], []>} : vector<8x32xbf16>, vector<32x384xbf16>, vector<8x384xf32> -> vector<8x384xf32>
    %53 = vector.broadcast %17 : vector<1x384xf32> to vector<8x384xf32>
    %54 = arith.addf %52, %53 : vector<8x384xf32>
    %55 = vector.extract_strided_slice %50 {offsets = [0, 0], sizes = [8, 32], strides = [1, 1]} : vector<8x384xf32> to vector<8x32xf32>
    %56 = vector.extract_strided_slice %54 {offsets = [0, 0], sizes = [8, 32], strides = [1, 1]} : vector<8x384xf32> to vector<8x32xf32>
    %57 = arith.addf %55, %56 : vector<8x32xf32>
    %58 = arith.negf %57 : vector<8x32xf32>
    %59 = math.exp %58 : vector<8x32xf32>
    %cst_18 = arith.constant 1.000000e+00 : f32
    %60 = vector.broadcast %cst_18 : f32 to vector<8x32xf32>
    %61 = arith.addf %60, %59 : vector<8x32xf32>
    %62 = arith.divf %60, %61 : vector<8x32xf32>
    %63 = vector.extract_strided_slice %50 {offsets = [0, 128], sizes = [8, 32], strides = [1, 1]} : vector<8x384xf32> to vector<8x32xf32>
    %64 = vector.extract_strided_slice %54 {offsets = [0, 128], sizes = [8, 32], strides = [1, 1]} : vector<8x384xf32> to vector<8x32xf32>
    %65 = arith.addf %63, %64 : vector<8x32xf32>
    %66 = arith.negf %65 : vector<8x32xf32>
    %67 = math.exp %66 : vector<8x32xf32>
    %cst_19 = arith.constant 1.000000e+00 : f32
    %68 = vector.broadcast %cst_19 : f32 to vector<8x32xf32>
    %69 = arith.addf %68, %67 : vector<8x32xf32>
    %70 = arith.divf %68, %69 : vector<8x32xf32>
    %71 = vector.extract_strided_slice %50 {offsets = [0, 256], sizes = [8, 32], strides = [1, 1]} : vector<8x384xf32> to vector<8x32xf32>
    %72 = vector.extract_strided_slice %54 {offsets = [0, 256], sizes = [8, 32], strides = [1, 1]} : vector<8x384xf32> to vector<8x32xf32>
    %73 = arith.mulf %62, %72 : vector<8x32xf32>
    %74 = arith.addf %71, %73 : vector<8x32xf32>
    %75 = math.tanh %74 : vector<8x32xf32>
    %cst_20 = arith.constant 1.000000e+00 : f32
    %76 = vector.broadcast %cst_20 : f32 to vector<8x32xf32>
    %77 = arith.subf %76, %70 : vector<8x32xf32>
    %78 = arith.mulf %77, %75 : vector<8x32xf32>
    %79 = arith.mulf %70, %49 : vector<8x32xf32>
    %80 = arith.addf %78, %79 : vector<8x32xf32>
    %81 = vector.extract_strided_slice %15 {offsets = [16, 0], sizes = [8, 384], strides = [1, 1]} : vector<32x384xf32> to vector<8x384xf32>
    %82 = arith.truncf %80 : vector<8x32xf32> to vector<8x32xbf16>
    %cst_21 = arith.constant dense<0.000000e+00> : vector<8x384xf32>
    %83 = tpu.matmul %82, %16, %cst_21 {dimension_numbers = #tpu.dot_dimension_numbers<[1], [0], [0], [1], [0, 0, 1, 1], [], []>} : vector<8x32xbf16>, vector<32x384xbf16>, vector<8x384xf32> -> vector<8x384xf32>
    %84 = vector.broadcast %17 : vector<1x384xf32> to vector<8x384xf32>
    %85 = arith.addf %83, %84 : vector<8x384xf32>
    %86 = vector.extract_strided_slice %81 {offsets = [0, 0], sizes = [8, 32], strides = [1, 1]} : vector<8x384xf32> to vector<8x32xf32>
    %87 = vector.extract_strided_slice %85 {offsets = [0, 0], sizes = [8, 32], strides = [1, 1]} : vector<8x384xf32> to vector<8x32xf32>
    %88 = arith.addf %86, %87 : vector<8x32xf32>
    %89 = arith.negf %88 : vector<8x32xf32>
    %90 = math.exp %89 : vector<8x32xf32>
    %cst_22 = arith.constant 1.000000e+00 : f32
    %91 = vector.broadcast %cst_22 : f32 to vector<8x32xf32>
    %92 = arith.addf %91, %90 : vector<8x32xf32>
    %93 = arith.divf %91, %92 : vector<8x32xf32>
    %94 = vector.extract_strided_slice %81 {offsets = [0, 128], sizes = [8, 32], strides = [1, 1]} : vector<8x384xf32> to vector<8x32xf32>
    %95 = vector.extract_strided_slice %85 {offsets = [0, 128], sizes = [8, 32], strides = [1, 1]} : vector<8x384xf32> to vector<8x32xf32>
    %96 = arith.addf %94, %95 : vector<8x32xf32>
    %97 = arith.negf %96 : vector<8x32xf32>
    %98 = math.exp %97 : vector<8x32xf32>
    %cst_23 = arith.constant 1.000000e+00 : f32
    %99 = vector.broadcast %cst_23 : f32 to vector<8x32xf32>
    %100 = arith.addf %99, %98 : vector<8x32xf32>
    %101 = arith.divf %99, %100 : vector<8x32xf32>
    %102 = vector.extract_strided_slice %81 {offsets = [0, 256], sizes = [8, 32], strides = [1, 1]} : vector<8x384xf32> to vector<8x32xf32>
    %103 = vector.extract_strided_slice %85 {offsets = [0, 256], sizes = [8, 32], strides = [1, 1]} : vector<8x384xf32> to vector<8x32xf32>
    %104 = arith.mulf %93, %103 : vector<8x32xf32>
    %105 = arith.addf %102, %104 : vector<8x32xf32>
    %106 = math.tanh %105 : vector<8x32xf32>
    %cst_24 = arith.constant 1.000000e+00 : f32
    %107 = vector.broadcast %cst_24 : f32 to vector<8x32xf32>
    %108 = arith.subf %107, %101 : vector<8x32xf32>
    %109 = arith.mulf %108, %106 : vector<8x32xf32>
    %110 = arith.mulf %101, %80 : vector<8x32xf32>
    %111 = arith.addf %109, %110 : vector<8x32xf32>
    %112 = vector.extract_strided_slice %15 {offsets = [24, 0], sizes = [8, 384], strides = [1, 1]} : vector<32x384xf32> to vector<8x384xf32>
    %113 = arith.truncf %111 : vector<8x32xf32> to vector<8x32xbf16>
    %cst_25 = arith.constant dense<0.000000e+00> : vector<8x384xf32>
    %114 = tpu.matmul %113, %16, %cst_25 {dimension_numbers = #tpu.dot_dimension_numbers<[1], [0], [0], [1], [0, 0, 1, 1], [], []>} : vector<8x32xbf16>, vector<32x384xbf16>, vector<8x384xf32> -> vector<8x384xf32>
    %115 = vector.broadcast %17 : vector<1x384xf32> to vector<8x384xf32>
    %116 = arith.addf %114, %115 : vector<8x384xf32>
    %117 = vector.extract_strided_slice %112 {offsets = [0, 0], sizes = [8, 32], strides = [1, 1]} : vector<8x384xf32> to vector<8x32xf32>
    %118 = vector.extract_strided_slice %116 {offsets = [0, 0], sizes = [8, 32], strides = [1, 1]} : vector<8x384xf32> to vector<8x32xf32>
    %119 = arith.addf %117, %118 : vector<8x32xf32>
    %120 = arith.negf %119 : vector<8x32xf32>
    %121 = math.exp %120 : vector<8x32xf32>
    %cst_26 = arith.constant 1.000000e+00 : f32
    %122 = vector.broadcast %cst_26 : f32 to vector<8x32xf32>
    %123 = arith.addf %122, %121 : vector<8x32xf32>
    %124 = arith.divf %122, %123 : vector<8x32xf32>
    %125 = vector.extract_strided_slice %112 {offsets = [0, 128], sizes = [8, 32], strides = [1, 1]} : vector<8x384xf32> to vector<8x32xf32>
    %126 = vector.extract_strided_slice %116 {offsets = [0, 128], sizes = [8, 32], strides = [1, 1]} : vector<8x384xf32> to vector<8x32xf32>
    %127 = arith.addf %125, %126 : vector<8x32xf32>
    %128 = arith.negf %127 : vector<8x32xf32>
    %129 = math.exp %128 : vector<8x32xf32>
    %cst_27 = arith.constant 1.000000e+00 : f32
    %130 = vector.broadcast %cst_27 : f32 to vector<8x32xf32>
    %131 = arith.addf %130, %129 : vector<8x32xf32>
    %132 = arith.divf %130, %131 : vector<8x32xf32>
    %133 = vector.extract_strided_slice %112 {offsets = [0, 256], sizes = [8, 32], strides = [1, 1]} : vector<8x384xf32> to vector<8x32xf32>
    %134 = vector.extract_strided_slice %116 {offsets = [0, 256], sizes = [8, 32], strides = [1, 1]} : vector<8x384xf32> to vector<8x32xf32>
    %135 = arith.mulf %124, %134 : vector<8x32xf32>
    %136 = arith.addf %133, %135 : vector<8x32xf32>
    %137 = math.tanh %136 : vector<8x32xf32>
    %cst_28 = arith.constant 1.000000e+00 : f32
    %138 = vector.broadcast %cst_28 : f32 to vector<8x32xf32>
    %139 = arith.subf %138, %132 : vector<8x32xf32>
    %140 = arith.mulf %139, %137 : vector<8x32xf32>
    %141 = arith.mulf %132, %111 : vector<8x32xf32>
    %142 = arith.addf %140, %141 : vector<8x32xf32>
    %c0_29 = arith.constant 0 : index
    %c0_30 = arith.constant 0 : index
    %143 = vector.load %arg1[%c0_29, %c0_30] : memref<1x8xi32, #tpu.memory_space<vmem>>, vector<1x8xi32>
    %144 = tpu.iota {dimensions = array<i32: 0>} : vector<2x8xi32>
    %145 = vector.broadcast %143 : vector<1x8xi32> to vector<2x8xi32>
    %146 = arith.cmpi eq, %145, %144 : vector<2x8xi32>
    %147 = arith.extui %146 : vector<2x8xi1> to vector<2x8xi32>
    %148 = arith.sitofp %147 : vector<2x8xi32> to vector<2x8xf32>
    %cst_31 = arith.constant dense<0.000000e+00> : vector<2xf32>
    %149 = vector.multi_reduction <add>, %148, %cst_31 [1] : vector<2x8xf32> to vector<2xf32>
    %150 = vector.shape_cast %149 : vector<2xf32> to vector<2x1xf32>
    %cst_32 = arith.constant 1.000000e+00 : f32
    %151 = vector.broadcast %cst_32 : f32 to vector<2x1xf32>
    %152 = arith.maximumf %150, %151 : vector<2x1xf32>
    %153 = vector.broadcast %152 : vector<2x1xf32> to vector<2x8xf32>
    %154 = arith.divf %148, %153 : vector<2x8xf32>
    %cst_33 = arith.constant dense<0.000000e+00> : vector<2x32xf32>
    %155 = tpu.matmul %154, %142, %cst_33 {dimension_numbers = #tpu.dot_dimension_numbers<[1], [0], [0], [1], [0, 0, 1, 1], [], []>} : vector<2x8xf32>, vector<8x32xf32>, vector<2x32xf32> -> vector<2x32xf32>
    %c0_34 = arith.constant 0 : index
    %c0_35 = arith.constant 0 : index
    %156 = vector.load %arg7[%c0_34, %c0_35] : memref<32x16xf32, #tpu.memory_space<vmem>>, vector<32x16xf32>
    %cst_36 = arith.constant dense<0.000000e+00> : vector<2x16xf32>
    %157 = tpu.matmul %155, %156, %cst_36 {dimension_numbers = #tpu.dot_dimension_numbers<[1], [0], [0], [1], [0, 0, 1, 1], [], []>} : vector<2x32xf32>, vector<32x16xf32>, vector<2x16xf32> -> vector<2x16xf32>
    %c0_37 = arith.constant 0 : index
    %c0_38 = arith.constant 0 : index
    %158 = vector.load %arg8[%c0_37, %c0_38] : memref<1x16xf32, #tpu.memory_space<vmem>>, vector<1x16xf32>
    %159 = vector.broadcast %158 : vector<1x16xf32> to vector<2x16xf32>
    %160 = arith.addf %157, %159 : vector<2x16xf32>
    %cst_39 = arith.constant 0.000000e+00 : f32
    %161 = vector.broadcast %cst_39 : f32 to vector<2x16xf32>
    %162 = arith.maximumf %160, %161 : vector<2x16xf32>
    %c0_40 = arith.constant 0 : index
    %c0_41 = arith.constant 0 : index
    %163 = vector.load %arg9[%c0_40, %c0_41] : memref<16x3xf32, #tpu.memory_space<vmem>>, vector<16x3xf32>
    %cst_42 = arith.constant dense<0.000000e+00> : vector<2x3xf32>
    %164 = tpu.matmul %162, %163, %cst_42 {dimension_numbers = #tpu.dot_dimension_numbers<[1], [0], [0], [1], [0, 0, 1, 1], [], []>} : vector<2x16xf32>, vector<16x3xf32>, vector<2x3xf32> -> vector<2x3xf32>
    %c0_43 = arith.constant 0 : index
    %c0_44 = arith.constant 0 : index
    %165 = vector.load %arg10[%c0_43, %c0_44] : memref<1x3xf32, #tpu.memory_space<vmem>>, vector<1x3xf32>
    %166 = vector.broadcast %165 : vector<1x3xf32> to vector<2x3xf32>
    %167 = arith.addf %164, %166 : vector<2x3xf32>
    %cst_45 = arith.constant dense<0xFF800000> : vector<2xf32>
    %168 = vector.multi_reduction <maximumf>, %167, %cst_45 [1] : vector<2x3xf32> to vector<2xf32>
    %169 = vector.shape_cast %168 : vector<2xf32> to vector<2x1xf32>
    %170 = vector.broadcast %169 : vector<2x1xf32> to vector<2x3xf32>
    %171 = arith.subf %167, %170 : vector<2x3xf32>
    %172 = math.exp %171 : vector<2x3xf32>
    %cst_46 = arith.constant dense<0.000000e+00> : vector<2xf32>
    %173 = vector.multi_reduction <add>, %172, %cst_46 [1] : vector<2x3xf32> to vector<2xf32>
    %174 = vector.shape_cast %173 : vector<2xf32> to vector<2x1xf32>
    %175 = math.log %174 : vector<2x1xf32>
    %176 = arith.addf %175, %169 : vector<2x1xf32>
    %177 = vector.broadcast %176 : vector<2x1xf32> to vector<2x3xf32>
    %178 = arith.subf %167, %177 : vector<2x3xf32>
    %c0_47 = arith.constant 0 : index
    %c0_48 = arith.constant 0 : index
    %179 = vector.load %arg11[%c0_47, %c0_48] : memref<2x3xf32, #tpu.memory_space<vmem>>, vector<2x3xf32>
    tpu.vector_store %arg11[%c0_47, %c0_48], %178 {strides = array<i32>} : memref<2x3xf32, #tpu.memory_space<vmem>>, vector<2x3xf32>,
    return
  }
}

</mosaic_0001>

<bundles_post_ra>
// kernel: tpu_custom_call.1
= control target key start
LH: loop header
LB: loop body
LE: loop exit
PB: predicated region body
PF: predicated region fallthrough
CT: control target
= control target key end

     0   :  { %vm65_vm0 = vcmask 1042432   ;;  %v911_v13 = vmov 0   ;;  %vm61_vm1 = vcmask 48128   ;;  %s1202_s0 = inlined_call_operand.vmem [shape: s32[32,1], index: 0, kind: input, shape index: {}]   ;;  %s1203_s1 = inlined_call_operand.vmem [shape: s32[1,8], index: 1, kind: input, shape index: {}]   ;;  %s1204_s2 = inlined_call_operand.vmem [shape: f32[16,6], index: 2, kind: input, shape index: {}]   ;;  %s1205_s3 = inlined_call_operand.vmem [shape: bf16[6,384], index: 3, kind: input, shape index: {}]   ;;  %s1206_s4 = inlined_call_operand.vmem [shape: f32[1,384], index: 4, kind: input, shape index: {}]   ;;  %s1207_s5 = inlined_call_operand.vmem [shape: bf16[32,384], index: 5, kind: input, shape index: {}]   ;;  %s1208_s6 = inlined_call_operand.vmem [shape: f32[1,384], index: 6, kind: input, shape index: {}]   ;;  %s1209_s7 = inlined_call_operand.vmem [shape: f32[32,16], index: 7, kind: input, shape index: {}]   ;;  %s1210_s8 = inlined_call_operand.vmem [shape: f32[1,16], index: 8, kind: input, shape index: {}]   ;;  %s1211_s9 = inlined_call_operand.vmem [shape: f32[16,3], index: 9, kind: input, shape index: {}]   ;;  %s1212_s10 = inlined_call_operand.vmem [shape: f32[1,3], index: 10, kind: input, shape index: {}]   ;;  %s1213_s11 = inlined_call_operand.hbm [shape: f32[2,3], index: 11, kind: output, shape index: {}]  }
   0x1   :  { %v43_v0 = vld [vmem:[%s1205_s3] sm:$0x77]  ;;  %v44_v1 = vld [vmem:[%s1205_s3 + $0x8] sm:$0x7]  ;;  %v122_v8 = vld [vmem:[%s1202_s0 + $0x10] sm:$0xff]  ;;  %834 = vset.pattern.permute.xlu0 %v911_v13  ;;  %835 = vset.pattern.permute.xlu1 %v911_v13 }
   0x2   :  { %v55_v2 = vunpack.c.l.b16 %v43_v0  ;;  %v56_v3 = vunpack.c.h.b16 %v43_v0  ;;  %v57_v4 = vunpack.c.l.b16 %v44_v1  ;;  %v40_v5 = vld [vmem:[%s1204_s2] sm:$0xff]  ;;  %v41_v7 = vld [vmem:[%s1204_s2 + $0x8] sm:$0xff]  ;;  %v794_v9 = vld [vmem:[%s1207_s5 + $0x18] sm:$0xf]  ;;  %133 = vperm.xlu1 %835, %v122_v8  }
   0x3   :  { %v120_v6 = vld [vmem:[%s1202_s0] sm:$0xff]  ;;  %v42_v19 = vpack.c.bf16 %v41_v7, %v40_v5  ;;  %v826_v21 = vld [vmem:[%s1207_s5 + $0x8] sm:$0xf0] }
   0x4   :  { %v58_v10 = vpack.c.b16 %v55_v2, %v55_v2  ;;  %v59_v11 = vpack.c.b16 %v56_v3, %v56_v3  ;;  %v60_v12 = vpack.c.b16 %v57_v4, %v57_v4  ;;  %v829_v14 = vld [vmem:[%s1207_s5 + $0x20] sm:$0xf0]  ;;  %127 = vperm.xlu0 %834, %v120_v6   ;;  %v782_v20 = vld [vmem:[%s1207_s5] sm:$0xf] }
   0x5   :  { %v1000_v15 = vor.u32 %v829_v14, %v794_v9 }
   0x6   :  { %v67_v16 = vsel %vm65_vm0, %v58_v10, 0  ;;  %v70_v17 = vsel %vm65_vm0, %v59_v11, 0  ;;  %v73_v18 = vsel %vm65_vm0, %v60_v12, 0 }
   0x7   :  { %82 = vmatpush.bf16.msra.mxu0 %v67_v16  ;;  %96 = vmatpush.bf16.msra.mxu1 %v70_v17 }
   0x8   :  { %16 = vsyncpa [#allocation3], 0  ;;  %110 = vmatpush.bf16.msra.mxu2 %v73_v18  ;;  %v121_v22 = vld [vmem:[%s1202_s0 + $0x8] sm:$0xff]  ;;  %v123_v23 = vld [vmem:[%s1202_s0 + $0x18] sm:$0xff]  ;;  %v1020_v24 = vor.u32 %v826_v21, %v782_v20  ;;  %v124_v35 = vlaneseq  ;;  %v912_v54 = vmov 0.0   ;;  %vm152_vm4 = vcmask 130048  }
   0x9   :  { %v828_v25 = vld [vmem:[%s1207_s5 + $0x1c] sm:$0xf]  ;;  %v796_v26 = vld [vmem:[%s1207_s5 + $0x24] sm:$0xf0]  ;;  %v825_v28 = vld [vmem:[%s1207_s5 + $0x4] sm:$0xf] }
   0xa   :  { %767 = vmatmul.msk.bf16.vlgmr.msra.gmra.mxu0 %vm61_vm1, %v42_v19  ;;  %768 = vmatmul.msk.bf16.vlgmr.msra.gmra.mxu1 %vm61_vm1, %v42_v19  ;;  %v1031_v27 = vor.u32 %v828_v25, %v796_v26  ;;  %v784_v29 = vld [vmem:[%s1207_s5 + $0xc] sm:$0xf0]  ;;  %v802_v31 = vld [vmem:[%s1207_s5 + $0x20] sm:$0xf]  ;;  %v830_v32 = vld [vmem:[%s1207_s5 + $0x28] sm:$0xf0] }
   0xb   :  { %769 = vmatmul.msk.bf16.vlgmr.msra.gmra.mxu2 %vm61_vm1, %v42_v19  ;;  %136 = vperm.xlu1 %835, %v123_v23   ;;  %v1040_v30 = vor.u32 %v825_v28, %v784_v29  ;;  %v1050_v33 = vor.u32 %v830_v32, %v802_v31  ;;  %v45_v38 = vld [vmem:[%s1206_s4] sm:$0x7]  ;;  %v125_v40 = vand.u32 127, %v124_v35  ;;  %v790_v45 = vld [vmem:[%s1207_s5 + $0x8] sm:$0xf]  ;;  %vm264_vm15 = vcmask 261120  }
   0xc   :  { %274 = vmatpush.bf16.msrb.mxu2 %v1000_v15  ;;  %130 = vperm.xlu0 %834, %v121_v22   ;;  %v48_v39 = vperm.slane %v45_v38, 1  ;;  %v47_v41 = vperm.slane %v45_v38, 0  ;;  %v827_v46 = vld [vmem:[%s1207_s5 + $0x10] sm:$0xf0]  ;;  %v49_v53 = vperm.slane %v45_v38, 2  ;;  %s758_s30 = sshll.u32 %s1213_s11, 4  ;;  %s759_s30 = int_to_ptr.hbm [resolvable:$true] %s758_s30 }
   0xd   :  { %v1063_v49 = vor.u32 %v827_v46, %v790_v45  ;;  %v224_v9 = vld [vmem:[%s1208_s6] sm:$0x7] }
   0xe   :  { %v1096_v10 = vperm.slane %v224_v9, 1  ;;  %v1099_v14 = vperm.slane %v224_v9, 0  ;;  %v1108_v38 = vperm.slane %v224_v9, 2 }
  0x10   :  { %275 = vmatpush.bf16.msrb.mxu2 %v1020_v24 }
  0x14   :  { %287 = vmatpush.bf16.msra.mxu2 %v1031_v27 }
  0x18   :  { %288 = vmatpush.bf16.msra.mxu2 %v1040_v30 }
  0x1b   :  { %276 = vmatmul.bf16.vlgmr.msrb.gmra.mxu2 %v911_v13 }
  0x1c   :  { %390 = vmatpush.bf16.msrb.mxu2 %v1050_v33 }
  0x20   :  { %391 = vmatpush.bf16.msrb.mxu2 %v1063_v49 }
  0x2b   :  { %289 = vmatmul.bf16.vlgmr.msra.gmra.mxu2 %v911_v13 }
  0x2c   :  { %544 = vmatpush.bf16.msra.mxu2 %v1000_v15 }
  0x30   :  { %545 = vmatpush.bf16.msra.mxu2 %v1020_v24 }
  0x74   :  { %v134_v57 = vpop.permute.xlu1 %133 }
  0x75   :  { %vm140_vm5 = vcmp.eq.s32.totalorder %v134_v57, %v125_v40 }
  0x76   :  { %v128_v34 = vpop.permute.xlu0 %127  ;;  %v772_v3 = vsel %vm140_vm5, 1.0, %v912_v54 }
  0x77   :  { %vm138_vm2 = vcmp.eq.s32.totalorder %v128_v34, %v125_v40 }
  0x78   :  { %v770_v55 = vsel %vm138_vm2, 1.0, %v912_v54 }
  0x7d   :  { %v137_v1 = vpop.permute.xlu1 %136 }
  0x7e   :  { %v131_v42 = vpop.permute.xlu0 %130  ;;  %vm141_vm6 = vcmp.eq.s32.totalorder %v137_v1, %v125_v40 }
  0x7f   :  { %vm139_vm3 = vcmp.eq.s32.totalorder %v131_v42, %v125_v40  ;;  %v773_v4 = vsel %vm141_vm6, 1.0, %v912_v54 }
  0x80   :  { %v771_v56 = vsel %vm139_vm3, 1.0, %v912_v54  ;;  %v151_v5 = vpack.c.bf16 %v773_v4, %v772_v3 }
  0x81   :  { %v150_v60 = vpack.c.bf16 %v771_v56, %v770_v55 }
  0x87   :  { %v84_v36 = vpop.f32.mrf.mxu0  ;;  %v98_v37 = vpop.f32.mrf.mxu1 }
  0x88   :  { %v99_v43 = vadd.f32 %v98_v37, %v48_v39  ;;  %v85_v50 = vadd.f32 %v84_v36, %v47_v41 }
  0x8e   :  { %v112_v44 = vpop.f32.mrf.mxu2 }
  0x8f   :  { %v86_v47 = vpop.f32.mrf.mxu0  ;;  %v100_v48 = vpop.f32.mrf.mxu1  ;;  %v113_v61 = vadd.f32 %v112_v44, %v49_v53 }
  0x90   :  { %v87_v51 = vadd.f32 %v86_v47, %v47_v41  ;;  %v101_v52 = vadd.f32 %v100_v48, %v48_v39 }
  0x92   :  { %v117_v58 = vpack.c.bf16 %v87_v51, %v85_v50  ;;  %v118_v59 = vpack.c.bf16 %v101_v52, %v99_v43 }
  0x94   :  { %166 = vmatpush.bf16.msra.mxu3 %v117_v58  ;;  %185 = vmatpush.bf16.msrb.mxu0 %v118_v59 }
  0x96   :  { %v114_v62 = vpop.f32.mrf.mxu2 }
  0x97   :  { %v115_v63 = vadd.f32 %v114_v62, %v49_v53  ;;  %774 = vmatmul.msk.bf16.vlgmr.msra.gmra.mxu3 %vm152_vm4, %v150_v60  ;;  %776 = vmatmul.msk.bf16.vlgmr.msrb.gmra.mxu0 %vm152_vm4, %v150_v60 }
  0x98   :  { %300 = vmatpush.bf16.msrb.mxu3 %v1050_v33  ;;  %364 = vmatpush.bf16.msra.mxu0 %v1000_v15 }
  0x99   :  { %v119_v0 = vpack.c.bf16 %v115_v63, %v113_v61 }
  0x9b   :  { %204 = vmatpush.bf16.msrb.mxu1 %v119_v0 }
  0x9c   :  { %301 = vmatpush.bf16.msrb.mxu3 %v1063_v49  ;;  %365 = vmatpush.bf16.msra.mxu0 %v1020_v24 }
  0x9e   :  { %778 = vmatmul.msk.bf16.vlgmr.msrb.gmra.mxu1 %vm152_vm4, %v150_v60  ;;  %v277_v2 = vpop.f32.mrf.mxu2 }
  0x9f   :  { %377 = vmatpush.bf16.msra.mxu1 %v1031_v27 }
  0xa0   :  { %454 = vmatpush.bf16.msra.mxu3 %v1000_v15  ;;  %467 = vmatpush.bf16.msrb.mxu0 %v1031_v27 }
  0xa3   :  { %378 = vmatpush.bf16.msra.mxu1 %v1040_v30 }
  0xa4   :  { %455 = vmatpush.bf16.msra.mxu3 %v1020_v24  ;;  %468 = vmatpush.bf16.msrb.mxu0 %v1040_v30 }
  0xa6   :  { %v279_v6 = vpop.f32.mrf.mxu2 }
  0xa7   :  { %480 = vmatpush.bf16.msrb.mxu1 %v1050_v33  ;;  %775 = vmatmul.msk.bf16.gmra.mxu3 %vm152_vm4, %v151_v5 }
  0xa8   :  { %777 = vmatmul.msk.bf16.gmra.mxu0 %vm152_vm4, %v151_v5 }
  0xab   :  { %481 = vmatpush.bf16.msrb.mxu1 %v1063_v49 }
  0xae   :  { %779 = vmatmul.msk.bf16.gmra.mxu1 %vm152_vm4, %v151_v5  ;;  %v290_v7 = vpop.f32.mrf.mxu2 }
  0xaf   :  { %v291_v11 = vadd.f32 %v290_v7, %v1096_v10 }
  0xb6   :  { %v292_v8 = vpop.f32.mrf.mxu2 }
  0xb7   :  { %302 = vmatmul.bf16.vlgmr.msrb.gmra.mxu3 %v911_v13  ;;  %v278_v13 = vadd.f32 %v277_v2, %v1099_v14 }
  0xb8   :  { %557 = vmatpush.bf16.msrb.mxu3 %v1031_v27 }
  0xbc   :  { %558 = vmatpush.bf16.msrb.mxu3 %v1040_v30 }
 0x114   :  { %v187_v12 = vpop.f32.mrf.mxu0 }
 0x115   :  { %v327_v15 = vadd.f32 %v291_v11, %v187_v12 }
 0x117   :  { %v805_v16 = vmul.f32 -1.442695, %v327_v15 }
 0x119   :  { %839 = vpow2.f32 %v805_v16 }
 0x11a   :  { %v168_v17 = vpop.f32.mrf.mxu3 }
 0x11b   :  { %v307_v18 = vadd.f32 %v278_v13, %v168_v17  ;;  %v206_v51 = vpop.f32.mrf.mxu1 }
 0x11c   :  { %v189_v0 = vpop.f32.mrf.mxu0 }
 0x11d   :  { %v804_v19 = vmul.f32 -1.442695, %v307_v18 }
 0x11f   :  { %841 = vpow2.f32 %v804_v19  ;;  %v840_v20 = vpop.eup %839 }
 0x120   :  { %v331_v22 = vadd.f32 1.0, %v840_v20 }
 0x122   :  { %v1102_v21 = vpop.f32.mrf.mxu3  ;;  %843 = vrcp.f32 %v331_v22  ;;  %v343_v47 = vand.u32 2147483648, %v331_v22  ;;  %vm337_vm12 = vweird.f32 %v331_v22  ;;  %v341_v50 = vand.u32 2147483647, %v331_v22 }
 0x123   :  { %v208_v1 = vpop.f32.mrf.mxu1 }
 0x124   :  { %v344_v55 = vor.u32 1.1754944e-38, %v343_v47  ;;  %vm342_vm14 = vcmp.eq.f32.partialorder %v341_v50, 8.507059e+37 }
 0x125   :  { %v842_v23 = vpop.eup %841  ;;  %v1120_v2 = vpop.f32.mrf.mxu0 }
 0x126   :  { %v311_v24 = vadd.f32 1.0, %v842_v23 }
 0x128   :  { %845 = vrcp.f32 %v311_v24  ;;  %v844_v26 = vpop.eup %843  ;;  %v323_v37 = vand.u32 2147483648, %v311_v24  ;;  %vm317_vm8 = vweird.f32 %v311_v24  ;;  %v321_v39 = vand.u32 2147483647, %v311_v24 }
 0x129   :  { %v333_v29 = vmul.f32 %v844_v26, %v331_v22  ;;  %vm338_vm11 = vweird.f32 %v844_v26 }
 0x12a   :  { %v1104_v25 = vpop.f32.mrf.mxu3  ;;  %v324_v43 = vor.u32 1.1754944e-38, %v323_v37  ;;  %vm322_vm10 = vcmp.eq.f32.partialorder %v321_v39, 8.507059e+37  ;;  %vm339_vm13 = vmor %vm337_vm12, %vm338_vm11 }
 0x12b   :  { %v334_v34 = vsub.f32 1.0, %v333_v29  ;;  %v1122_v3 = vpop.f32.mrf.mxu1 }
 0x12d   :  { %v335_v40 = vmul.f32 %v844_v26, %v334_v34  ;;  %v1124_v4 = vpop.f32.mrf.mxu0 }
 0x12e   :  { %v846_v27 = vpop.eup %845 }
 0x12f   :  { %v313_v28 = vmul.f32 %v846_v27, %v311_v24  ;;  %vm318_vm7 = vweird.f32 %v846_v27  ;;  %v336_v45 = vadd.f32 %v844_v26, %v335_v40 }
 0x130   :  { %vm319_vm9 = vmor %vm317_vm8, %vm318_vm7 }
 0x131   :  { %v314_v30 = vsub.f32 1.0, %v313_v28  ;;  %v340_v53 = vsel %vm339_vm13, %v844_v26, %v336_v45 }
 0x132   :  { %v1106_v31 = vpop.f32.mrf.mxu3  ;;  %v345_v57 = vsel %vm342_vm14, %v344_v55, %v340_v53 }
 0x133   :  { %v315_v32 = vmul.f32 %v846_v27, %v314_v30  ;;  %v350_v58 = vsub.f32 1.0, %v345_v57  ;;  %v352_v61 = vmul.f32 0.0, %v345_v57  ;;  %v1126_v5 = vpop.f32.mrf.mxu1 }
 0x135   :  { %v316_v36 = vadd.f32 %v846_v27, %v315_v32 }
 0x137   :  { %v320_v41 = vsel %vm319_vm9, %v846_v27, %v316_v36  ;;  %vm631_vm9 = vcmask 58368  }
 0x138   :  { %v325_v46 = vsel %vm322_vm10, %v324_v43, %v320_v41 }
 0x13a   :  { %v303_v42 = vpop.f32.mrf.mxu3 }
 0x13b   :  { %v304_v44 = vadd.f32 %v303_v42, %v1108_v38 }
 0x13d   :  { %v347_v48 = vmul.f32 %v325_v46, %v304_v44 }
 0x13f   :  { %v348_v52 = vadd.f32 %v347_v48, %v206_v51 }
 0x141   :  { %847 = vtanh.f32 %v348_v52 }
 0x142   :  { %v305_v56 = vpop.f32.mrf.mxu3 }
 0x147   :  { %v848_v59 = vpop.eup %847 }
 0x148   :  { %v351_v60 = vmul.f32 %v848_v59, %v350_v58 }
 0x14a   :  { %v1111_v62 = vadd.f32 %v352_v61, %v351_v60 }
 0x14c   :  { %v354_v63 = vpack.c.bf16 %v1111_v62, %v1111_v62 }
 0x14e   :  { %806 = vmatmul.msk.bf16.vlgmr.msra.gmra.mxu0 %vm264_vm15, %v354_v63  ;;  %807 = vmatmul.msk.bf16.vlgmr.msra.gmra.mxu1 %vm264_vm15, %v354_v63 }
 0x14f   :  { %808 = vmatmul.msk.bf16.vlgmr.msrb.gmra.mxu2 %vm264_vm15, %v354_v63  ;;  %570 = vmatpush.bf16.msra.mxu0 %v1050_v33 }
 0x153   :  { %571 = vmatpush.bf16.msra.mxu0 %v1063_v49 }
 0x1cb   :  { %v367_v6 = vpop.f32.mrf.mxu0  ;;  %v380_v7 = vpop.f32.mrf.mxu1 }
 0x1cc   :  { %v368_v8 = vadd.f32 %v367_v6, %v1099_v14  ;;  %v381_v9 = vadd.f32 %v380_v7, %v1096_v10 }
 0x1ce   :  { %v397_v33 = vadd.f32 %v368_v8, %v1102_v21  ;;  %v417_v11 = vadd.f32 %v381_v9, %v189_v0 }
 0x1d0   :  { %v809_v49 = vmul.f32 -1.442695, %v397_v33  ;;  %v810_v12 = vmul.f32 -1.442695, %v417_v11 }
 0x1d2   :  { %849 = vpow2.f32 %v809_v49  ;;  %v393_v15 = vpop.f32.mrf.mxu2 }
 0x1d3   :  { %851 = vpow2.f32 %v810_v12  ;;  %v369_v16 = vpop.f32.mrf.mxu0  ;;  %v382_v13 = vpop.f32.mrf.mxu1  ;;  %v394_v39 = vadd.f32 %v393_v15, %v1108_v38 }
 0x1d4   :  { %v836_v16 = vld [vmem:[%s1203_s1] ss:$0 sm:$0xff] }
 0x1d8   :  { %v850_v17 = vpop.eup %849 }
 0x1d9   :  { %v852_v18 = vpop.eup %851  ;;  %v401_v19 = vadd.f32 1.0, %v850_v17 }
 0x1da   :  { %v421_v20 = vadd.f32 1.0, %v852_v18  ;;  %v395_v22 = vpop.f32.mrf.mxu2 }
 0x1db   :  { %853 = vrcp.f32 %v401_v19  ;;  %v413_v29 = vand.u32 2147483648, %v401_v19  ;;  %v411_v32 = vand.u32 2147483647, %v401_v19  ;;  %vm407_vm1 = vweird.f32 %v401_v19 }
 0x1dc   :  { %855 = vrcp.f32 %v421_v20  ;;  %v433_v43 = vand.u32 2147483648, %v421_v20  ;;  %vm427_vm6 = vweird.f32 %v421_v20  ;;  %v431_v45 = vand.u32 2147483647, %v421_v20 }
 0x1dd   :  { %v414_v37 = vor.u32 1.1754944e-38, %v413_v29  ;;  %vm412_vm3 = vcmp.eq.f32.partialorder %v411_v32, 8.507059e+37 }
 0x1de   :  { %v434_v48 = vor.u32 1.1754944e-38, %v433_v43  ;;  %vm432_vm8 = vcmp.eq.f32.partialorder %v431_v45, 8.507059e+37 }
 0x1e1   :  { %v854_v23 = vpop.eup %853 }
 0x1e2   :  { %v856_v24 = vpop.eup %855  ;;  %v403_v26 = vmul.f32 %v854_v23, %v401_v19  ;;  %vm408_vm0 = vweird.f32 %v854_v23 }
 0x1e3   :  { %v423_v27 = vmul.f32 %v856_v24, %v421_v20  ;;  %vm409_vm2 = vmor %vm407_vm1, %vm408_vm0  ;;  %vm428_vm5 = vweird.f32 %v856_v24 }
 0x1e4   :  { %v404_v21 = vsub.f32 1.0, %v403_v26  ;;  %vm429_vm7 = vmor %vm427_vm6, %vm428_vm5 }
 0x1e5   :  { %v424_v28 = vsub.f32 1.0, %v423_v27 }
 0x1e6   :  { %v405_v30 = vmul.f32 %v854_v23, %v404_v21 }
 0x1e7   :  { %v425_v34 = vmul.f32 %v856_v24, %v424_v28 }
 0x1e8   :  { %v406_v36 = vadd.f32 %v854_v23, %v405_v30 }
 0x1e9   :  { %v426_v42 = vadd.f32 %v856_v24, %v425_v34 }
 0x1ea   :  { %v410_v40 = vsel %vm409_vm2, %v854_v23, %v406_v36 }
 0x1eb   :  { %v415_v41 = vsel %vm412_vm3, %v414_v37, %v410_v40  ;;  %v430_v47 = vsel %vm429_vm7, %v856_v24, %v426_v42 }
 0x1ec   :  { %v437_v44 = vmul.f32 %v415_v41, %v394_v39  ;;  %v435_v50 = vsel %vm432_vm8, %v434_v48, %v430_v47 }
 0x1ed   :  { %v440_v51 = vsub.f32 1.0, %v435_v50  ;;  %v442_v55 = vmul.f32 %v435_v50, %v1111_v62 }
 0x1ee   :  { %v438_v46 = vadd.f32 %v437_v44, %v208_v1 }
 0x1f0   :  { %857 = vtanh.f32 %v438_v46 }
 0x1f6   :  { %v858_v52 = vpop.eup %857 }
 0x1f7   :  { %v441_v53 = vmul.f32 %v858_v52, %v440_v51 }
 0x1f9   :  { %v1133_v56 = vadd.f32 %v442_v55, %v441_v53 }
 0x1fb   :  { %v444_v57 = vpack.c.bf16 %v1133_v56, %v1133_v56 }
 0x1fd   :  { %811 = vmatmul.msk.bf16.vlgmr.msra.gmra.mxu3 %vm264_vm15, %v444_v57  ;;  %812 = vmatmul.msk.bf16.vlgmr.msrb.gmra.mxu0 %vm264_vm15, %v444_v57 }
 0x1fe   :  { %813 = vmatmul.msk.bf16.vlgmr.msrb.gmra.mxu1 %vm264_vm15, %v444_v57 }
 0x27a   :  { %v470_v58 = vpop.f32.mrf.mxu0 }
 0x27b   :  { %v471_v59 = vadd.f32 %v470_v58, %v1096_v10  ;;  %v483_v60 = vpop.f32.mrf.mxu1 }
 0x27c   :  { %v484_v28 = vadd.f32 %v483_v60, %v1108_v38 }
 0x27d   :  { %v507_v61 = vadd.f32 %v471_v59, %v1120_v2  ;;  %v626_v2 = vshrl.u32 %v124_v35, 7 }
 0x27f   :  { %v815_v63 = vmul.f32 -1.442695, %v507_v61  ;;  %vm628_vm10 = vcmp.eq.s32.totalorder %v836_v16, %v626_v2 }
 0x280   :  { %v457_v0 = vpop.f32.mrf.mxu3  ;;  %v1149_v17 = vsel %vm628_vm10, 1.0, %v912_v54 }
 0x281   :  { %859 = vpow2.f32 %v815_v63  ;;  %v458_v62 = vadd.f32 %v457_v0, %v1099_v14  ;;  %v632_v19 = vsel %vm631_vm9, %v1149_v17, 0.0 }
 0x282   :  { %v472_v1 = vpop.f32.mrf.mxu0  ;;  %633 = vadd.xlane.f32.xlu2 %v632_v19 }
 0x283   :  { %v487_v6 = vadd.f32 %v458_v62, %v1104_v25  ;;  %v485_v7 = vpop.f32.mrf.mxu1 }
 0x285   :  { %v814_v8 = vmul.f32 -1.442695, %v487_v6 }
 0x287   :  { %v860_v9 = vpop.eup %859  ;;  %861 = vpow2.f32 %v814_v8 }
 0x288   :  { %v511_v33 = vadd.f32 1.0, %v860_v9  ;;  %v459_v11 = vpop.f32.mrf.mxu3 }
 0x28a   :  { %863 = vrcp.f32 %v511_v33  ;;  %v523_v32 = vand.u32 2147483648, %v511_v33  ;;  %vm517_vm1 = vweird.f32 %v511_v33  ;;  %v521_v36 = vand.u32 2147483647, %v511_v33 }
 0x28c   :  { %v524_v40 = vor.u32 1.1754944e-38, %v523_v32  ;;  %vm522_vm3 = vcmp.eq.f32.partialorder %v521_v36, 8.507059e+37 }
 0x28d   :  { %v862_v49 = vpop.eup %861 }
 0x28e   :  { %v491_v12 = vadd.f32 1.0, %v862_v49 }
 0x290   :  { %865 = vrcp.f32 %v491_v12  ;;  %v864_v15 = vpop.eup %863  ;;  %v503_v23 = vand.u32 2147483648, %v491_v12  ;;  %v501_v35 = vand.u32 2147483647, %v491_v12  ;;  %vm497_vm12 = vweird.f32 %v491_v12 }
 0x291   :  { %v513_v13 = vmul.f32 %v864_v15, %v511_v33  ;;  %vm518_vm0 = vweird.f32 %v864_v15 }
 0x292   :  { %v504_v21 = vor.u32 1.1754944e-38, %v503_v23  ;;  %vm502_vm14 = vcmp.eq.f32.partialorder %v501_v35, 8.507059e+37  ;;  %vm519_vm2 = vmor %vm517_vm1, %vm518_vm0 }
 0x293   :  { %v514_v20 = vsub.f32 1.0, %v513_v13 }
 0x295   :  { %v515_v26 = vmul.f32 %v864_v15, %v514_v20 }
 0x296   :  { %v866_v25 = vpop.eup %865 }
 0x297   :  { %v493_v18 = vmul.f32 %v866_v25, %v491_v12  ;;  %vm498_vm11 = vweird.f32 %v866_v25  ;;  %v516_v54 = vadd.f32 %v864_v15, %v515_v26 }
 0x298   :  { %vm499_vm13 = vmor %vm497_vm12, %vm498_vm11 }
 0x299   :  { %v494_v22 = vsub.f32 1.0, %v493_v18  ;;  %v520_v39 = vsel %vm519_vm2, %v864_v15, %v516_v54  ;;  %vm651_vm2 = vcmask 64512  }
 0x29a   :  { %v525_v41 = vsel %vm522_vm3, %v524_v40, %v520_v39 }
 0x29b   :  { %v495_v24 = vmul.f32 %v866_v25, %v494_v22  ;;  %v530_v42 = vsub.f32 1.0, %v525_v41  ;;  %v532_v45 = vmul.f32 %v525_v41, %v1133_v56 }
 0x29d   :  { %v496_v27 = vadd.f32 %v866_v25, %v495_v24 }
 0x29f   :  { %v500_v29 = vsel %vm499_vm13, %v866_v25, %v496_v27 }
 0x2a0   :  { %v505_v30 = vsel %vm502_vm14, %v504_v21, %v500_v29 }
 0x2a1   :  { %v527_v34 = vmul.f32 %v505_v30, %v484_v28 }
 0x2a3   :  { %v528_v37 = vadd.f32 %v527_v34, %v1122_v3 }
 0x2a5   :  { %867 = vtanh.f32 %v528_v37 }
 0x2ab   :  { %v868_v43 = vpop.eup %867 }
 0x2ac   :  { %v531_v44 = vmul.f32 %v868_v43, %v530_v42 }
 0x2ae   :  { %v1155_v46 = vadd.f32 %v532_v45, %v531_v44  ;;  %v675_v45 = vld [vmem:[%s1209_s7] sm:$0xff] }
 0x2b0   :  { %v534_v47 = vpack.c.bf16 %v1155_v46, %v1155_v46 }
 0x2b2   :  { %816 = vmatmul.msk.bf16.vlgmr.msra.gmra.mxu2 %vm264_vm15, %v534_v47  ;;  %817 = vmatmul.msk.bf16.vlgmr.msrb.gmra.mxu3 %vm264_vm15, %v534_v47 }
 0x2b3   :  { %818 = vmatmul.msk.bf16.vlgmr.msra.gmra.mxu0 %vm264_vm15, %v534_v47 }
 0x2f5   :  { %v634_v59 = vpop.xlane.xlu2 %633 }
 0x2f6   :  { %v635_v63 = vmax.f32 %v634_v59, 1.0 }
 0x2f8   :  { %vm641_vm11 = vweird.f32 %v635_v63  ;;  %v647_v29 = vand.u32 2147483648, %v635_v63  ;;  %v645_v32 = vand.u32 2147483647, %v635_v63 }
 0x2fa   :  { %v648_v36 = vor.u32 1.1754944e-38, %v647_v29  ;;  %vm646_vm1 = vcmp.eq.f32.partialorder %v645_v32, 8.507059e+37 }
 0x330   :  { %v573_v3 = vpop.f32.mrf.mxu0 }
 0x331   :  { %v574_v20 = vadd.f32 %v573_v3, %v1108_v38  ;;  %v708_v3 = vld [vmem:[%s1211_s9 + $0x8] sm:$0xff] }
 0x332   :  { %730 = vmatpush.msra.mxu3 %v708_v3 }
 0x335   :  { %v547_v48 = vpop.f32.mrf.mxu2  ;;  %v560_v50 = vpop.f32.mrf.mxu3 }
 0x336   :  { %v548_v51 = vadd.f32 %v547_v48, %v1099_v14  ;;  %v561_v52 = vadd.f32 %v560_v50, %v1096_v10  ;;  %v678_v10 = vld [vmem:[%s1209_s7 + $0x18] sm:$0xff]  ;;  %v677_v14 = vld [vmem:[%s1209_s7 + $0x10] sm:$0xff] }
 0x337   :  { %698 = vmatpush.msrb.mxu2 %v678_v10 }
 0x338   :  { %v577_v53 = vadd.f32 %v548_v51, %v1106_v31  ;;  %v597_v55 = vadd.f32 %v561_v52, %v1124_v4  ;;  %v575_v56 = vpop.f32.mrf.mxu0  ;;  %v676_v31 = vld [vmem:[%s1209_s7 + $0x8] sm:$0xff]  ;;  %v838_v52 = vld [vmem:[%s1212_s10] ss:$0 sm:$0xff] }
 0x339   :  { %699 = vmatpush.msrb.mxu2 %v677_v14 }
 0x33a   :  { %v819_v57 = vmul.f32 -1.442695, %v577_v53  ;;  %v820_v58 = vmul.f32 -1.442695, %v597_v55 }
 0x33b   :  { %700 = vmatpush.msrb.mxu2 %v676_v31 }
 0x33c   :  { %869 = vpow2.f32 %v819_v57 }
 0x33d   :  { %871 = vpow2.f32 %v820_v58  ;;  %v549_v60 = vpop.f32.mrf.mxu2  ;;  %v562_v61 = vpop.f32.mrf.mxu3  ;;  %701 = vmatpush.msrb.mxu2 %v675_v45 }
 0x33e   :  { %873 = vrcp.f32 %v635_v63 }
 0x342   :  { %v870_v0 = vpop.eup %869 }
 0x343   :  { %v872_v62 = vpop.eup %871  ;;  %v581_v1 = vadd.f32 1.0, %v870_v0 }
 0x344   :  { %v601_v6 = vadd.f32 1.0, %v872_v62  ;;  %v874_v4 = vpop.eup %873 }
 0x345   :  { %875 = vrcp.f32 %v581_v1  ;;  %v637_v49 = vmul.f32 %v874_v4, %v635_v63  ;;  %v593_v12 = vand.u32 2147483648, %v581_v1  ;;  %v591_v16 = vand.u32 2147483647, %v581_v1 }
 0x346   :  { %877 = vrcp.f32 %v601_v6  ;;  %vm587_vm6 = vweird.f32 %v581_v1  ;;  %v613_v26 = vand.u32 2147483648, %v601_v6  ;;  %vm607_vm10 = vweird.f32 %v601_v6 }
 0x347   :  { %v638_v18 = vsub.f32 1.0, %v637_v49  ;;  %v594_v19 = vor.u32 1.1754944e-38, %v593_v12  ;;  %vm592_vm8 = vcmp.eq.f32.partialorder %v591_v16, 8.507059e+37  ;;  %v611_v21 = vand.u32 2147483647, %v601_v6 }
 0x348   :  { %vm642_vm12 = vweird.f32 %v874_v4  ;;  %v614_v38 = vor.u32 1.1754944e-38, %v613_v26 }
 0x349   :  { %v639_v35 = vmul.f32 %v874_v4, %v638_v18  ;;  %vm643_vm14 = vmor %vm641_vm11, %vm642_vm12  ;;  %vm612_vm0 = vcmp.eq.f32.partialorder %v611_v21, 8.507059e+37 }
 0x34b   :  { %v876_v7 = vpop.eup %875  ;;  %v640_v30 = vadd.f32 %v874_v4, %v639_v35 }
 0x34c   :  { %v878_v8 = vpop.eup %877  ;;  %v583_v9 = vmul.f32 %v876_v7, %v581_v1  ;;  %vm588_vm5 = vweird.f32 %v876_v7 }
 0x34d   :  { %v603_v33 = vmul.f32 %v878_v8, %v601_v6  ;;  %vm589_vm7 = vmor %vm587_vm6, %vm588_vm5  ;;  %vm608_vm9 = vweird.f32 %v878_v8  ;;  %v644_v37 = vsel %vm643_vm14, %v874_v4, %v640_v30 }
 0x34e   :  { %v584_v11 = vsub.f32 1.0, %v583_v9  ;;  %vm609_vm13 = vmor %vm607_vm10, %vm608_vm9  ;;  %v649_v43 = vsel %vm646_vm1, %v648_v36, %v644_v37 }
 0x34f   :  { %v604_v15 = vsub.f32 1.0, %v603_v33 }
 0x350   :  { %v585_v2 = vmul.f32 %v876_v7, %v584_v11 }
 0x351   :  { %v605_v13 = vmul.f32 %v878_v8, %v604_v15 }
 0x352   :  { %v586_v25 = vadd.f32 %v876_v7, %v585_v2 }
 0x353   :  { %v606_v24 = vadd.f32 %v878_v8, %v605_v13 }
 0x354   :  { %v590_v22 = vsel %vm589_vm7, %v876_v7, %v586_v25 }
 0x355   :  { %v595_v23 = vsel %vm592_vm8, %v594_v19, %v590_v22  ;;  %v610_v54 = vsel %vm609_vm13, %v878_v8, %v606_v24 }
 0x356   :  { %v617_v27 = vmul.f32 %v595_v23, %v574_v20  ;;  %v615_v34 = vsel %vm612_vm0, %v614_v38, %v610_v54 }
 0x357   :  { %v620_v39 = vsub.f32 1.0, %v615_v34  ;;  %v622_v42 = vmul.f32 %v615_v34, %v1155_v46  ;;  %v707_v46 = vld [vmem:[%s1211_s9] sm:$0xff] }
 0x358   :  { %v618_v28 = vadd.f32 %v617_v27, %v1126_v5  ;;  %v650_v5 = vmul.f32 %v1149_v17, %v649_v43  ;;  %731 = vmatpush.msra.mxu3 %v707_v46  ;;  %v837_v17 = vld [vmem:[%s1210_s8] ss:$0 sm:$0xff]  ;;  %s913_s8 = smov [#allocation2]  }
 0x359   :  { %s756_s9 = sshll.u32 %s913_s8, 4  ;;  %s757_s9 = int_to_ptr.vmem [resolvable:$true] %s756_s9 }
 0x35a   :  { %879 = vtanh.f32 %v618_v28 }
 0x360   :  { %v880_v40 = vpop.eup %879 }
 0x361   :  { %v621_v41 = vmul.f32 %v880_v40, %v620_v39 }
 0x363   :  { %v623_v44 = vadd.f32 %v622_v42, %v621_v41 }
 0x365   :  { %670 = vmatpush.msra.mxu1 %v623_v44 }
 0x366   :  { %822 = vmatmul.msk.f32.vlgmr.msra.gmra.mxu1 %vm651_vm2, %v650_v5 }
 0x3e3   :  { %v672_v47 = vpop.f32.mrf.mxu1 }
 0x3e4   :  { %823 = vmatmul.msk.f32.vlgmr.msrb.gmra.mxu2 %vm264_vm15, %v672_v47  ;;  %vm736_vm15 = vcmask 17408  }
 0x467   :  { %v703_v48 = vpop.f32.mrf.mxu2 }
 0x468   :  { %v704_v50 = vadd.f32 %v837_v17, %v703_v48 }
 0x46a   :  { %v706_v51 = vmax.f32 %v704_v50, 0.0 }
 0x46c   :  { %824 = vmatmul.msk.f32.vlgmr.msra.gmra.mxu3 %vm152_vm4, %v706_v51 }
 0x4ef   :  { %v733_v53 = vpop.f32.mrf.mxu3 }
 0x4f0   :  { %v734_v55 = vadd.f32 %v838_v52, %v733_v53 }
 0x4f2   :  { %v737_v56 = vsel %vm736_vm15, %v734_v55, -inf }
 0x4f3   :  { %738 = vmax.xlane.f32.xlu2 %v737_v56 }
 0x566   :  { %v739_v57 = vpop.xlane.xlu2 %738 }
 0x567   :  { %v740_v58 = vsub.f32 %v734_v55, %v739_v57 }
 0x569   :  { %v741_v59 = vmul.f32 1.442695, %v740_v58 }
 0x56b   :  { %881 = vpow2.f32 %v741_v59 }
 0x571   :  { %v882_v60 = vpop.eup %881 }
 0x572   :  { %v743_v61 = vsel %vm736_vm15, %v882_v60, 0.0 }
 0x573   :  { %744 = vadd.xlane.f32.xlu0 %v743_v61 }
 0x5e6   :  { %v745_v63 = vpop.xlane.xlu0 %744 }
 0x5e7   :  { %883 = vlog2.f32 %v745_v63 }
 0x5ed   :  { %v884_v0 = vpop.eup %883 }
 0x5ee   :  { %v747_v62 = vmul.f32 0.6931472, %v884_v0 }
 0x5f0   :  { %v748_v1 = vadd.f32 %v747_v62, %v739_v57 }
 0x5f2   :  { %v749_v6 = vsub.f32 %v734_v55, %v748_v1 }
 0x5f4   :  { %750 = vst.msk [vmem:[#allocation2] sm:$0x3] %vm736_vm15, %v749_v6 }
 0x5f5   :  { %761 = dma.vmem_to_hbm [thread:$0]  %s757_s9, 32, %s759_s30, [#allocation3]  }
 0x5f6   :  { %909 = dma.done.wait [#allocation3], 32  }
 0x5f7   :  { %910 = vsyncadd [#allocation3], 4294967264 }
 0x5f8   :  { %766 = vsyncpa [#allocation3], 1 }

</bundles_post_ra>
